<compile_context>
chip_gen: v5e
topology: v5e:2x2
jax: 0.10.0
libtpu: 0.0.40
codegen_flags: <defaults>
</compile_context>

<pallas_src>
import math

import jax
import jax.numpy as jnp
from jax import lax
from jax.experimental import pallas as pl
from jax.experimental.pallas import tpu as pltpu


def _round_up(x, m):
    return ((x + m - 1) // m) * m


def _pick_tile(dim, quantum, cap):
    """Largest multiple of `quantum` (<= cap) that evenly divides `dim`.

    Falls back to the full dim (block == full array dim is always legal).
    """
    best = dim
    d = quantum
    limit = min(dim, cap)
    while d <= limit:
        if dim % d == 0:
            best = d
        d += quantum
    return best


def _pick_batch_tile(b, cap=4):
    for d in range(min(b, cap), 0, -1):
        if b % d == 0:
            return d
    return 1


def _sparse_coding_kernel(x_ref, w_ref, o_ref, acc_ref):
    # x_ref  : (TILE_B, TILE_N, TILE_T)  -- native (B, N, T) layout, no permute
    # w_ref  : (TILE_K, TILE_N)
    # o_ref  : (TILE_B, TILE_T, TILE_K)  -- lane axis = padded Ks (multiple of 128)
    # acc_ref: (TILE_B, TILE_T, TILE_K)  float32 accumulator, resident across n
    @pl.when(pl.program_id(3) == 0)
    def _():
        acc_ref[...] = jnp.zeros_like(acc_ref)

    w = w_ref[...]  # (TILE_K, TILE_N)

    # Static unroll over the batch tile: amortizes per-grid-step overhead while
    # keeping each MXU call a plain 2-D matmul.
    for i in range(x_ref.shape[0]):
        # C[i] += X[i]^T @ W^T : contract the N axis of both operands.
        acc_ref[i] += lax.dot_general(
            x_ref[i], w,
            dimension_numbers=(((0,), (1,)), ((), ())),
            preferred_element_type=jnp.float32,
        )  # (TILE_T, TILE_K)

    @pl.when(pl.program_id(3) == pl.num_programs(3) - 1)
    def _():
        o_ref[...] = acc_ref[...].astype(o_ref.dtype)


def sparse_coding_spatial(x, dic_weight):
    """x: (B, N, T), dic_weight: (Ks, N) -> (C, dic_weight).

    C has shape (B, T, Ks) == X.permute(0, 2, 1) @ dic_weight.T
    """
    B, N, T = x.shape
    Ks, N2 = dic_weight.shape
    assert N == N2

    # Lane-dense output: pad Ks (output last dim) up to a multiple of 128 so the
    # output stores are unmasked full-lane writes. Padded dictionary rows are
    # zero; padded output columns are sliced off below.
    ks_pad = _round_up(Ks, 128)
    w_pad = dic_weight if ks_pad == Ks else jnp.pad(
        dic_weight, ((0, ks_pad - Ks), (0, 0)))

    # Conservative tile caps: fit default scoped VMEM on all generations,
    # comfortably under v7x's 64 MiB even with double buffering.
    tile_b = _pick_batch_tile(B, cap=4)
    tile_t = _pick_tile(T, 128, 256)
    tile_k = _pick_tile(ks_pad, 128, 256)
    tile_n = _pick_tile(N, 128, 512)

    grid = (B // tile_b, T // tile_t, ks_pad // tile_k, N // tile_n)

    flops = 2 * B * T * N * ks_pad
    bytes_accessed = x.dtype.itemsize * (B * N * T + ks_pad * N + B * T * ks_pad)

    c_pad = pl.pallas_call(
        _sparse_coding_kernel,
        out_shape=jax.ShapeDtypeStruct((B, T, ks_pad), x.dtype),
        grid_spec=pltpu.PrefetchScalarGridSpec(
            num_scalar_prefetch=0,
            grid=grid,
            in_specs=[
                # X in native (B, N, T) layout -> no HBM transpose pass.
                pl.BlockSpec((tile_b, tile_n, tile_t),
                             lambda b, t, k, n: (b, n, t)),
                pl.BlockSpec((tile_k, tile_n),
                             lambda b, t, k, n: (k, n)),
            ],
            # Output block index is constant across the reduction axis n, so the
            # accumulator stays resident in VMEM across the n grid steps.
            out_specs=pl.BlockSpec((tile_b, tile_t, tile_k),
                                   lambda b, t, k, n: (b, t, k)),
            scratch_shapes=[pltpu.VMEM((tile_b, tile_t, tile_k), jnp.float32)],
        ),
        compiler_params=pltpu.CompilerParams(
            dimension_semantics=("parallel", "parallel", "parallel", "arbitrary"),
        ),
        cost_estimate=pl.CostEstimate(
            flops=flops, transcendentals=0, bytes_accessed=bytes_accessed),
    )(x, w_pad)

    c = c_pad if ks_pad == Ks else c_pad[:, :, :Ks]
    return c, dic_weight


def init_dic_weight(key, Ks, N, dtype=jnp.float32):
    # Mirrors torch.nn.init.kaiming_uniform_ on a (Ks, N) tensor:
    # fan_in = N, gain = sqrt(2) (a=0, leaky_relu), bound = gain * sqrt(3 / fan_in)
    bound = math.sqrt(2.0) * math.sqrt(3.0 / N)
    return jax.random.uniform(key, (Ks, N), dtype=dtype, minval=-bound, maxval=bound)


if __name__ == "__main__":
    key = jax.random.PRNGKey(0)
    k_x, k_w, k_x2, k_w2 = jax.random.split(key, 4)

    # --- Test 1: small shapes matching the module's typical use -------------
    B, N, T, Ks = 2, 32, 16, 16           # X: (B, N, T) as in the PyTorch forward
    x = jax.random.normal(k_x, (B, N, T), dtype=jnp.float32)
    dic_w = init_dic_weight(k_w, Ks, N)

    C, W_out = sparse_coding_spatial(x, dic_w)
    C = jax.block_until_ready(C)

    C_ref = jnp.einsum("bnt,kn->btk", x, dic_w)
    assert C.shape == (B, T, Ks)
    assert jnp.allclose(C, C_ref, atol=1e-4, rtol=1e-4)
    assert W_out.shape == (Ks, N)

    # --- Test 2: modest shapes exercising Ks padding and the N-reduction ----
    B2, N2_, T2, Ks2 = 2, 256, 128, 200
    x2 = jax.random.normal(k_x2, (B2, N2_, T2), dtype=jnp.float32)
    dic_w2 = init_dic_weight(k_w2, Ks2, N2_)

    C2, W2_out = sparse_coding_spatial(x2, dic_w2)
    C2 = jax.block_until_ready(C2)

    C2_ref = jnp.einsum("bnt,kn->btk", x2, dic_w2)
    assert C2.shape == (B2, T2, Ks2)
    assert jnp.allclose(C2, C2_ref, atol=2e-3, rtol=2e-3)
    assert W2_out.shape == (Ks2, N2_)

    print("KERNEL_OK")
</pallas_src>

<mosaic_0001>
module attributes {stable_mosaic.version = 11 : i64} {
  func.func @_sparse_coding_kernel(%arg0: i32, %arg1: i32, %arg2: i32, %arg3: i32, %arg4: memref<2x32x16xf32, #tpu.memory_space<vmem>>, %arg5: memref<128x32xf32, #tpu.memory_space<vmem>>, %arg6: memref<2x16x128xf32, #tpu.memory_space<vmem>>, %arg7: memref<2x16x128xf32, #tpu.memory_space<vmem>>) attributes {dimension_semantics = [#tpu.dimension_semantics<parallel>, #tpu.dimension_semantics<parallel>, #tpu.dimension_semantics<parallel>, #tpu.dimension_semantics<arbitrary>], iteration_bounds = array<i64: 1, 1, 1, 1>, scalar_prefetch = 0 : i64, scratch_operands = 1 : i64, tpu.core_type = #tpu.core_type<tc>, window_params = [{transform_indices = @transform_0, window_bounds = array<i64: 2, 32, 16>}, {transform_indices = @transform_1, window_bounds = array<i64: 128, 32>}, {transform_indices = @transform_2, window_bounds = array<i64: 2, 16, 128>}]} {
    %c0_i32 = arith.constant 0 : i32
    %0 = arith.cmpi eq, %arg3, %c0_i32 : i32
    %1 = arith.extui %0 : i1 to i32
    %c0_i32_0 = arith.constant 0 : i32
    %2 = arith.cmpi ne, %1, %c0_i32_0 : i32
    scf.if %2 {
      %cst_22 = arith.constant 0.000000e+00 : f32
      %25 = vector.broadcast %cst_22 : f32 to vector<2x16x128xf32>
      %c0_23 = arith.constant 0 : index
      %c0_24 = arith.constant 0 : index
      %c0_25 = arith.constant 0 : index
      %26 = vector.load %arg7[%c0_23, %c0_24, %c0_25] : memref<2x16x128xf32, #tpu.memory_space<vmem>>, vector<2x16x128xf32>
      tpu.vector_store %arg7[%c0_23, %c0_24, %c0_25], %25 {strides = array<i32>} : memref<2x16x128xf32, #tpu.memory_space<vmem>>, vector<2x16x128xf32>,
    } else {
    }
    %c0 = arith.constant 0 : index
    %c0_1 = arith.constant 0 : index
    %3 = vector.load %arg5[%c0, %c0_1] : memref<128x32xf32, #tpu.memory_space<vmem>>, vector<128x32xf32>
    %c0_2 = arith.constant 0 : index
    %c0_3 = arith.constant 0 : index
    %c0_4 = arith.constant 0 : index
    %4 = vector.load %arg7[%c0_2, %c0_3, %c0_4] : memref<2x16x128xf32, #tpu.memory_space<vmem>>, vector<1x16x128xf32>
    %5 = vector.shape_cast %4 : vector<1x16x128xf32> to vector<16x128xf32>
    %c0_5 = arith.constant 0 : index
    %c0_6 = arith.constant 0 : index
    %c0_7 = arith.constant 0 : index
    %6 = vector.load %arg4[%c0_5, %c0_6, %c0_7] : memref<2x32x16xf32, #tpu.memory_space<vmem>>, vector<1x32x16xf32>
    %7 = vector.shape_cast %6 : vector<1x32x16xf32> to vector<32x16xf32>
    %cst = arith.constant dense<0.000000e+00> : vector<16x128xf32>
    %8 = tpu.matmul %7, %3, %cst {dimension_numbers = #tpu.dot_dimension_numbers<[0], [1], [1], [0], [0, 1, 1, 0], [], []>} : vector<32x16xf32>, vector<128x32xf32>, vector<16x128xf32> -> vector<16x128xf32>
    %9 = arith.addf %5, %8 : vector<16x128xf32>
    %c0_8 = arith.constant 0 : index
    %c0_9 = arith.constant 0 : index
    %c0_10 = arith.constant 0 : index
    %10 = vector.load %arg7[%c0_8, %c0_9, %c0_10] : memref<2x16x128xf32, #tpu.memory_space<vmem>>, vector<1x16x128xf32>
    %11 = vector.shape_cast %10 : vector<1x16x128xf32> to vector<16x128xf32>
    %12 = vector.shape_cast %9 : vector<16x128xf32> to vector<1x16x128xf32>
    tpu.vector_store %arg7[%c0_8, %c0_9, %c0_10], %12 {strides = array<i32>} : memref<2x16x128xf32, #tpu.memory_space<vmem>>, vector<1x16x128xf32>,
    %c1 = arith.constant 1 : index
    %c0_11 = arith.constant 0 : index
    %c0_12 = arith.constant 0 : index
    %13 = vector.load %arg7[%c1, %c0_11, %c0_12] : memref<2x16x128xf32, #tpu.memory_space<vmem>>, vector<1x16x128xf32>
    %14 = vector.shape_cast %13 : vector<1x16x128xf32> to vector<16x128xf32>
    %c1_13 = arith.constant 1 : index
    %c0_14 = arith.constant 0 : index
    %c0_15 = arith.constant 0 : index
    %15 = vector.load %arg4[%c1_13, %c0_14, %c0_15] : memref<2x32x16xf32, #tpu.memory_space<vmem>>, vector<1x32x16xf32>
    %16 = vector.shape_cast %15 : vector<1x32x16xf32> to vector<32x16xf32>
    %cst_16 = arith.constant dense<0.000000e+00> : vector<16x128xf32>
    %17 = tpu.matmul %16, %3, %cst_16 {dimension_numbers = #tpu.dot_dimension_numbers<[0], [1], [1], [0], [0, 1, 1, 0], [], []>} : vector<32x16xf32>, vector<128x32xf32>, vector<16x128xf32> -> vector<16x128xf32>
    %18 = arith.addf %14, %17 : vector<16x128xf32>
    %c1_17 = arith.constant 1 : index
    %c0_18 = arith.constant 0 : index
    %c0_19 = arith.constant 0 : index
    %19 = vector.load %arg7[%c1_17, %c0_18, %c0_19] : memref<2x16x128xf32, #tpu.memory_space<vmem>>, vector<1x16x128xf32>
    %20 = vector.shape_cast %19 : vector<1x16x128xf32> to vector<16x128xf32>
    %21 = vector.shape_cast %18 : vector<16x128xf32> to vector<1x16x128xf32>
    tpu.vector_store %arg7[%c1_17, %c0_18, %c0_19], %21 {strides = array<i32>} : memref<2x16x128xf32, #tpu.memory_space<vmem>>, vector<1x16x128xf32>,
    %c0_i32_20 = arith.constant 0 : i32
    %22 = arith.cmpi eq, %arg3, %c0_i32_20 : i32
    %23 = arith.extui %22 : i1 to i32
    %c0_i32_21 = arith.constant 0 : i32
    %24 = arith.cmpi ne, %23, %c0_i32_21 : i32
    scf.if %24 {
      %c0_22 = arith.constant 0 : index
      %c0_23 = arith.constant 0 : index
      %c0_24 = arith.constant 0 : index
      %25 = vector.load %arg7[%c0_22, %c0_23, %c0_24] : memref<2x16x128xf32, #tpu.memory_space<vmem>>, vector<2x16x128xf32>
      %c0_25 = arith.constant 0 : index
      %c0_26 = arith.constant 0 : index
      %c0_27 = arith.constant 0 : index
      %26 = vector.load %arg6[%c0_25, %c0_26, %c0_27] : memref<2x16x128xf32, #tpu.memory_space<vmem>>, vector<2x16x128xf32>
      tpu.vector_store %arg6[%c0_25, %c0_26, %c0_27], %25 {strides = array<i32>} : memref<2x16x128xf32, #tpu.memory_space<vmem>>, vector<2x16x128xf32>,
    } else {
    }
    return
  }
  func.func @transform_0(%arg0: i32, %arg1: i32, %arg2: i32, %arg3: i32) -> (i32, i32, i32) {
    %c0_i32 = arith.constant 0 : i32
    return %arg0, %arg3, %arg1 : i32, i32, i32
  }
  func.func @transform_1(%arg0: i32, %arg1: i32, %arg2: i32, %arg3: i32) -> (i32, i32) {
    %c0_i32 = arith.constant 0 : i32
    return %arg2, %arg3 : i32, i32
  }
  func.func @transform_2(%arg0: i32, %arg1: i32, %arg2: i32, %arg3: i32) -> (i32, i32, i32) {
    %c0_i32 = arith.constant 0 : i32
    return %arg0, %arg1, %arg2 : i32, i32, i32
  }
}

</mosaic_0001>

<bundles_post_ra>
// kernel: tpu_custom_call.1
= control target key start
LH: loop header
LB: loop body
LE: loop exit
PB: predicated region body
PF: predicated region fallthrough
CT: control target
= control target key end

     0   :  { %vm74_vm0 = vcmask 261120   ;;  %s521_s0 = inlined_call_operand.vmem [shape: f32[2,32,16], index: 0, kind: input, shape index: {}]   ;;  %s522_s1 = inlined_call_operand.vmem [shape: f32[128,32], index: 1, kind: input, shape index: {}]   ;;  %s523_s2 = inlined_call_operand.hbm [shape: f32[2,16,128], index: 2, kind: output, shape index: {}]  }
   0x1   :  { %v276_v0 = vld [vmem:[%s521_s0 + $0x20] sm:$0xff]  ;;  %v35_v2 = vld [vmem:[%s522_s1 + $0x78] sm:$0xff]  ;;  %v34_v3 = vld [vmem:[%s522_s1 + $0x70] sm:$0xff] }
   0x2   :  { %v38_v1 = vld [vmem:[%s521_s0] sm:$0xff]  ;;  %164 = vxpose.xlu1.b32.start [1/4] (short) (narrow) %v276_v0, 16  ;;  %258 = vmatpush.xpose.msk.msra.mxu0 %vm74_vm0, %v35_v2  ;;  %v277_v4 = vld [vmem:[%s521_s0 + $0x28] sm:$0xff] }
   0x3   :  { %42 = vxpose.xlu0.b32.start [1/4] (short) (narrow) %v38_v1, 16  ;;  %280 = vmatpush.xpose.msk.msra.mxu1 %vm74_vm0, %v35_v2  ;;  %v39_v5 = vld [vmem:[%s521_s0 + $0x8] sm:$0xff] }
   0x4   :  { %298 = vmatpush.xpose.msk.msra.mxu2 %vm74_vm0, %v35_v2  ;;  %314 = vmatpush.xpose.msk.msra.mxu3 %vm74_vm0, %v35_v2 }
   0x5   :  { %7 = vsyncpa [#allocation4], 0  ;;  %v33_v6 = vld [vmem:[%s522_s1 + $0x68] sm:$0xff]  ;;  %v32_v7 = vld [vmem:[%s522_s1 + $0x60] sm:$0xff]  ;;  %s246_s3 = sshll.u32 %s523_s2, 4  ;;  %s361_s4 = smov 128   ;;  %s247_s3 = int_to_ptr.hbm [resolvable:$true] %s246_s3 }
   0x6   :  { %259 = vmatpush.xpose.msk.msra.mxu0 %vm74_vm0, %v34_v3  ;;  %v278_v8 = vld [vmem:[%s521_s0 + $0x30] sm:$0xff]  ;;  %v31_v10 = vld [vmem:[%s522_s1 + $0x58] sm:$0xff]  ;;  %v29_v14 = vld [vmem:[%s522_s1 + $0x48] sm:$0xff]  ;;  %s362_s5 = smov 8  }
   0x7   :  { %281 = vmatpush.xpose.msk.msra.mxu1 %vm74_vm0, %v34_v3  ;;  %v40_v9 = vld [vmem:[%s521_s0 + $0x10] sm:$0xff]  ;;  %v279_v12 = vld [vmem:[%s521_s0 + $0x38] sm:$0xff]  ;;  %v28_v15 = vld [vmem:[%s522_s1 + $0x40] sm:$0xff] }
   0x8   :  { %299 = vmatpush.xpose.msk.msra.mxu2 %vm74_vm0, %v34_v3  ;;  %315 = vmatpush.xpose.msk.msra.mxu3 %vm74_vm0, %v34_v3  ;;  %v30_v11 = vld [vmem:[%s522_s1 + $0x50] sm:$0xff]  ;;  %v41_v13 = vld [vmem:[%s521_s0 + $0x18] sm:$0xff]  ;;  %v25_v18 = vld [vmem:[%s522_s1 + $0x28] sm:$0xff] }
   0x9   :  { %v27_v16 = vld [vmem:[%s522_s1 + $0x38] sm:$0xff]  ;;  %v26_v17 = vld [vmem:[%s522_s1 + $0x30] sm:$0xff]  ;;  %v24_v19 = vld [vmem:[%s522_s1 + $0x20] sm:$0xff] }
   0xa   :  { %165 = vxpose.xlu1.b32.cont [2/4] (short) (narrow) %v277_v4, 16  ;;  %260 = vmatpush.xpose.msk.msra.mxu0 %vm74_vm0, %v33_v6  ;;  %v23_v20 = vld [vmem:[%s522_s1 + $0x18] sm:$0xff]  ;;  %v22_v21 = vld [vmem:[%s522_s1 + $0x10] sm:$0xff]  ;;  %v21_v22 = vld [vmem:[%s522_s1 + $0x8] sm:$0xff] }
   0xb   :  { %43 = vxpose.xlu0.b32.cont [2/4] (short) (narrow) %v39_v5, 16  ;;  %282 = vmatpush.xpose.msk.msra.mxu1 %vm74_vm0, %v33_v6  ;;  %v20_v23 = vld [vmem:[%s522_s1] sm:$0xff]  ;;  %s360_s1 = smov [#allocation3]  }
   0xc   :  { %300 = vmatpush.xpose.msk.msra.mxu2 %vm74_vm0, %v33_v6  ;;  %316 = vmatpush.xpose.msk.msra.mxu3 %vm74_vm0, %v33_v6  ;;  %s244_s28 = sshll.u32 %s360_s1, 4  ;;  %s245_s28 = int_to_ptr.vmem [resolvable:$true] %s244_s28 }
   0xe   :  { %261 = vmatpush.xpose.msk.msra.mxu0 %vm74_vm0, %v32_v7 }
   0xf   :  { %283 = vmatpush.xpose.msk.msra.mxu1 %vm74_vm0, %v32_v7 }
  0x10   :  { %301 = vmatpush.xpose.msk.msra.mxu2 %vm74_vm0, %v32_v7  ;;  %317 = vmatpush.xpose.msk.msra.mxu3 %vm74_vm0, %v32_v7 }
  0x12   :  { %166 = vxpose.xlu1.b32.cont [3/4] (short) (narrow) %v278_v8, 16  ;;  %262 = vmatpush.xpose.msk.msra.mxu0 %vm74_vm0, %v31_v10 }
  0x13   :  { %44 = vxpose.xlu0.b32.cont [3/4] (short) (narrow) %v40_v9, 16  ;;  %284 = vmatpush.xpose.msk.msra.mxu1 %vm74_vm0, %v31_v10 }
  0x14   :  { %302 = vmatpush.xpose.msk.msra.mxu2 %vm74_vm0, %v31_v10  ;;  %318 = vmatpush.xpose.msk.msra.mxu3 %vm74_vm0, %v31_v10 }
  0x16   :  { %263 = vmatpush.xpose.msk.msra.mxu0 %vm74_vm0, %v30_v11 }
  0x17   :  { %285 = vmatpush.xpose.msk.msra.mxu1 %vm74_vm0, %v30_v11 }
  0x18   :  { %303 = vmatpush.xpose.msk.msra.mxu2 %vm74_vm0, %v30_v11  ;;  %319 = vmatpush.xpose.msk.msra.mxu3 %vm74_vm0, %v30_v11 }
  0x1a   :  { %167 = vxpose.xlu1.b32.end [4/4] (short) (narrow) %v279_v12, 16  ;;  %264 = vmatpush.xpose.msk.msra.mxu0 %vm74_vm0, %v29_v14 }
  0x1b   :  { %45 = vxpose.xlu0.b32.end [4/4] (short) (narrow) %v41_v13, 16  ;;  %286 = vmatpush.xpose.msk.msra.mxu1 %vm74_vm0, %v29_v14 }
  0x1c   :  { %304 = vmatpush.xpose.msk.msra.mxu2 %vm74_vm0, %v29_v14  ;;  %320 = vmatpush.xpose.msk.msra.mxu3 %vm74_vm0, %v29_v14 }
  0x1e   :  { %265 = vmatpush.xpose.msk.msra.mxu0 %vm74_vm0, %v28_v15 }
  0x1f   :  { %287 = vmatpush.xpose.msk.msra.mxu1 %vm74_vm0, %v28_v15 }
  0x20   :  { %305 = vmatpush.xpose.msk.msra.mxu2 %vm74_vm0, %v28_v15  ;;  %321 = vmatpush.xpose.msk.msra.mxu3 %vm74_vm0, %v28_v15 }
  0x22   :  { %266 = vmatpush.xpose.msk.msra.mxu0 %vm74_vm0, %v27_v16 }
  0x23   :  { %288 = vmatpush.xpose.msk.msra.mxu1 %vm74_vm0, %v27_v16 }
  0x24   :  { %306 = vmatpush.xpose.msk.msra.mxu2 %vm74_vm0, %v27_v16  ;;  %322 = vmatpush.xpose.msk.msra.mxu3 %vm74_vm0, %v27_v16 }
  0x26   :  { %267 = vmatpush.xpose.msk.msra.mxu0 %vm74_vm0, %v26_v17 }
  0x27   :  { %289 = vmatpush.xpose.msk.msra.mxu1 %vm74_vm0, %v26_v17 }
  0x28   :  { %307 = vmatpush.xpose.msk.msra.mxu2 %vm74_vm0, %v26_v17  ;;  %323 = vmatpush.xpose.msk.msra.mxu3 %vm74_vm0, %v26_v17 }
  0x2a   :  { %268 = vmatpush.xpose.msk.msra.mxu0 %vm74_vm0, %v25_v18 }
  0x2b   :  { %290 = vmatpush.xpose.msk.msra.mxu1 %vm74_vm0, %v25_v18 }
  0x2c   :  { %308 = vmatpush.xpose.msk.msra.mxu2 %vm74_vm0, %v25_v18  ;;  %324 = vmatpush.xpose.msk.msra.mxu3 %vm74_vm0, %v25_v18 }
  0x2e   :  { %269 = vmatpush.xpose.msk.msra.mxu0 %vm74_vm0, %v24_v19 }
  0x2f   :  { %291 = vmatpush.xpose.msk.msra.mxu1 %vm74_vm0, %v24_v19 }
  0x30   :  { %309 = vmatpush.xpose.msk.msra.mxu2 %vm74_vm0, %v24_v19  ;;  %325 = vmatpush.xpose.msk.msra.mxu3 %vm74_vm0, %v24_v19 }
  0x32   :  { %270 = vmatpush.xpose.msk.msra.mxu0 %vm74_vm0, %v23_v20 }
  0x33   :  { %292 = vmatpush.xpose.msk.msra.mxu1 %vm74_vm0, %v23_v20 }
  0x34   :  { %310 = vmatpush.xpose.msk.msra.mxu2 %vm74_vm0, %v23_v20  ;;  %326 = vmatpush.xpose.msk.msra.mxu3 %vm74_vm0, %v23_v20 }
  0x36   :  { %271 = vmatpush.xpose.msk.msra.mxu0 %vm74_vm0, %v22_v21 }
  0x37   :  { %293 = vmatpush.xpose.msk.msra.mxu1 %vm74_vm0, %v22_v21 }
  0x38   :  { %311 = vmatpush.xpose.msk.msra.mxu2 %vm74_vm0, %v22_v21  ;;  %327 = vmatpush.xpose.msk.msra.mxu3 %vm74_vm0, %v22_v21 }
  0x3a   :  { %272 = vmatpush.xpose.msk.msra.mxu0 %vm74_vm0, %v21_v22 }
  0x3b   :  { %294 = vmatpush.xpose.msk.msra.mxu1 %vm74_vm0, %v21_v22 }
  0x3c   :  { %312 = vmatpush.xpose.msk.msra.mxu2 %vm74_vm0, %v21_v22  ;;  %328 = vmatpush.xpose.msk.msra.mxu3 %vm74_vm0, %v21_v22 }
  0x3e   :  { %273 = vmatpush.xpose.msk.msra.mxu0 %vm74_vm0, %v20_v23 }
  0x3f   :  { %295 = vmatpush.xpose.msk.msra.mxu1 %vm74_vm0, %v20_v23 }
  0x40   :  { %313 = vmatpush.xpose.msk.msra.mxu2 %vm74_vm0, %v20_v23  ;;  %329 = vmatpush.xpose.msk.msra.mxu3 %vm74_vm0, %v20_v23 }
  0xa6   :  { %v180_v24 = vpop.trf.xlu1 }
  0xa7   :  { %v58_v25 = vpop.trf.xlu0  ;;  %296 = vmatmul.msk.f32.vlgmr.msra.gmra.mxu1 %vm74_vm0, %v180_v24 }
  0xa8   :  { %274 = vmatmul.msk.f32.vlgmr.msra.gmra.mxu0 %vm74_vm0, %v58_v25 }
  0xae   :  { %v181_v26 = vpop.trf.xlu1 }
  0xaf   :  { %v59_v27 = vpop.trf.xlu0  ;;  %297 = vmatmul.msk.f32.vlgmr.msra.gmra.mxu3 %vm74_vm0, %v181_v26 }
  0xb0   :  { %275 = vmatmul.msk.f32.vlgmr.msra.gmra.mxu2 %vm74_vm0, %v59_v27 }
 0x124   :  { %v219_v29 = vpop.f32.mrf.mxu1 }
 0x125   :  { %v146_v28 = vpop.f32.mrf.mxu0  ;;  %238 = vst [vmem:[#allocation3 + $0x10] sm:$0xff] %v219_v29 }
 0x126   :  { %236 = vst [vmem:[#allocation3] sm:$0xff] %v146_v28 }
 0x132   :  { %v222_v31 = vpop.f32.mrf.mxu3 }
 0x133   :  { %v149_v30 = vpop.f32.mrf.mxu2  ;;  %239 = vst [vmem:[#allocation3 + $0x18] sm:$0xff] %v222_v31 }
 0x134   :  { %237 = vst [vmem:[#allocation3 + $0x8] sm:$0xff] %v149_v30 }
 0x135   :  { %252 = dma.vmem_to_hbm [thread:$0]  %s245_s28, 512, %s247_s3, [#allocation4], %s361_s4, %s361_s4, %s362_s5  }
 0x136   :  { %358 = dma.done.wait [#allocation4], 512  }
 0x137   :  { %359 = vsyncadd [#allocation4], 4294966784 }
 0x138   :  { %257 = vsyncpa [#allocation4], 1 }

</bundles_post_ra>
